<compile_context>
chip_gen: v6e
topology: v6e:2x2x1
jax: 0.10.0
libtpu: 0.0.40
codegen_flags: <defaults>
</compile_context>

<pallas_src>
import functools
import math

import jax
import jax.numpy as jnp
from jax.experimental import pallas as pl
from jax.experimental.pallas import tpu as pltpu


# ----------------------------------------------------------------------------
# Kernel
# ----------------------------------------------------------------------------
def _make_nbeats_kernel(layer_num: int, compute_dtype):
    """Kernel: `layer_num` hidden fc layers + one fused, pre-sliced theta head."""

    def kernel(*refs):
        # ref layout:
        #   x_ref,
        #   w0..w{L-1}, b0..b{L-1},   (hidden stack, W as [in, out_pad], b as [1, out_pad])
        #   wh, bh,                   (fused head: [layer_pad, out_pad], [1, out_pad])
        #   out_ref                   (single lane-dense slab (tm, out_pad))
        x_ref = refs[0]
        w_refs = refs[1 : 1 + layer_num]
        b_refs = refs[1 + layer_num : 1 + 2 * layer_num]
        wh_ref, bh_ref = refs[1 + 2 * layer_num : 3 + 2 * layer_num]
        out_ref = refs[3 + 2 * layer_num]

        # Cast the loaded tile in-kernel (no wrapper-side cast pass over x).
        h = x_ref[...].astype(compute_dtype)
        for w_ref, b_ref in zip(w_refs, b_refs):
            # MXU matmul with f32 accumulation; bias-add + ReLU stay in f32.
            z = jnp.dot(h, w_ref[...], preferred_element_type=jnp.float32)
            z = jnp.maximum(z + b_ref[...], 0.0)
            h = z.astype(compute_dtype)
            # nn.Dropout in eval mode is identity -> no-op.

        # Single fused head matmul; columns were pre-sliced/padded in the
        # wrapper, so this is one unmasked lane-dense store.
        theta = (
            jnp.dot(h, wh_ref[...], preferred_element_type=jnp.float32) + bh_ref[...]
        )
        out_ref[...] = theta.astype(out_ref.dtype)

    return kernel


# ----------------------------------------------------------------------------
# Param preparation (one-time, outside jit)
# ----------------------------------------------------------------------------
def _round_up(x: int, m: int) -> int:
    return ((x + m - 1) // m) * m


def prepare_params(
    params, backcast_size, forecast_size, compute_dtype=jnp.float32, pad_to=128
):
    """One-time weight re-layout + zero padding.

    - hidden weights: [out, in] -> [in, out], columns (and rows for layers > 0)
      zero-padded to layer_pad = round_up(layer_size, pad_to), cast to compute_dtype
    - biases:         [out] -> [1, layer_pad], zero-padded, kept f32
    - theta heads: fused into one [layer_pad, out_pad] weight whose real columns
      are exactly theta_b[:, :backcast] and theta_f[:, -forecast:]; the rest are 0.
    Zero padding keeps all padded activations exactly 0 through bias+ReLU.
    """
    fc_w, fc_b, wb, bb, wf, bf = params
    theta_size = wb.shape[0]
    layer_size = fc_w[0].shape[0]
    layer_pad = _round_up(layer_size, pad_to)
    out_real = backcast_size + forecast_size
    out_pad = _round_up(out_real, pad_to)

    ws, bs = [], []
    for i, (w, b) in enumerate(zip(fc_w, fc_b)):
        wt = jnp.asarray(w, jnp.float32).T  # [fan_in, layer_size]
        row_pad = 0 if i == 0 else layer_pad - wt.shape[0]  # x itself is unpadded
        wt = jnp.pad(wt, ((0, row_pad), (0, layer_pad - wt.shape[1])))
        ws.append(wt.astype(compute_dtype))
        bp = jnp.pad(jnp.asarray(b, jnp.float32), (0, layer_pad - b.shape[0]))
        bs.append(bp.reshape(1, -1))

    wh = jnp.concatenate(
        [
            jnp.asarray(wb, jnp.float32).T[:, :backcast_size],
            jnp.asarray(wf, jnp.float32).T[:, theta_size - forecast_size :],
        ],
        axis=1,
    )  # [layer_size, out_real]
    wh = jnp.pad(
        wh, ((0, layer_pad - layer_size), (0, out_pad - out_real))
    ).astype(compute_dtype)
    bh = jnp.concatenate(
        [
            jnp.asarray(bb, jnp.float32)[:backcast_size],
            jnp.asarray(bf, jnp.float32)[theta_size - forecast_size :],
        ]
    )
    bh = jnp.pad(bh, (0, out_pad - out_real)).reshape(1, -1)

    return tuple(ws), tuple(bs), wh, bh


# ----------------------------------------------------------------------------
# Wrapper
# ----------------------------------------------------------------------------
def _choose_tm(batch: int, block_m: int) -> int:
    tm = min(block_m, _round_up(batch, 8))
    # MXU-friendly M granularity (256 preferred on v6e/v7x, 128 on v5e).
    if tm >= 256:
        tm = (tm // 256) * 256
    elif tm >= 128:
        tm = (tm // 128) * 128
    # Megacore: prefer >= 2 grid steps when the batch is big enough to split,
    # so both v7x TensorCores get work.
    if batch > 256 and pl.cdiv(batch, tm) == 1:
        tm = _round_up(pl.cdiv(batch, 2), 128)
    return tm


def nbeats_block_forward(
    x,
    prepared,
    backcast_size,
    forecast_size,
    *,
    block_m: int = 1024,
    compute_dtype=jnp.float32,
):
    """NbeatsBlock forward: batch-tiled Pallas kernel with VMEM-resident weights."""
    ws, bs, wh, bh = prepared
    layer_num = len(ws)
    batch, input_size = x.shape
    layer_pad = wh.shape[0]
    out_pad = wh.shape[1]

    tm = _choose_tm(batch, block_m)
    grid_m = pl.cdiv(batch, tm)  # ragged last block handled by Pallas (no pad)

    def resident(arr):
        # Full-array block, same block (0, 0) every grid step -> stays in VMEM.
        # Constant index_map => double-buffering buys nothing: single-buffer it.
        return pl.BlockSpec(
            arr.shape, lambda i: (0, 0), pipeline_mode=pl.Buffered(1)
        )

    in_specs = [pl.BlockSpec((tm, input_size), lambda i: (i, 0))]
    in_specs += [resident(w) for w in ws]
    in_specs += [resident(b) for b in bs]
    in_specs += [resident(wh), resident(bh)]

    out_specs = pl.BlockSpec((tm, out_pad), lambda i: (i, 0))
    out_shape = jax.ShapeDtypeStruct((batch, out_pad), jnp.float32)

    # --- VMEM budget: resident (single-buffered) weights + double-buffered
    # x / out tiles + live f32 activations + headroom; capped generation-aware.
    def _nbytes(a):
        return a.size * a.dtype.itemsize

    weight_bytes = sum(_nbytes(a) for a in (*ws, *bs, wh, bh))
    x_tile_bytes = 2 * tm * input_size * x.dtype.itemsize
    out_tile_bytes = 2 * tm * out_pad * 4
    act_bytes = 3 * tm * max(layer_pad, out_pad, input_size) * 4
    needed = weight_bytes + x_tile_bytes + out_tile_bytes + act_bytes + (8 << 20)
    try:
        vmem_cap = int(
            getattr(pltpu.get_tpu_info(), "vmem_capacity_bytes", 64 << 20)
        )
    except Exception:  # be robust if HW query is unavailable
        vmem_cap = 64 << 20
    vmem_limit = int(min(max(needed, 32 << 20), (vmem_cap * 3) // 4))

    # --- Cost estimate so XLA can schedule surrounding ops around the kernel.
    flops = 2 * grid_m * tm * (
        input_size * layer_pad
        + (layer_num - 1) * layer_pad * layer_pad
        + layer_pad * out_pad
    )
    bytes_accessed = _nbytes(x) + weight_bytes + batch * out_pad * 4
    cost = pl.CostEstimate(
        flops=int(flops), transcendentals=0, bytes_accessed=int(bytes_accessed)
    )

    out = pl.pallas_call(
        _make_nbeats_kernel(layer_num, compute_dtype),
        grid=(grid_m,),
        in_specs=in_specs,
        out_specs=out_specs,
        out_shape=out_shape,
        compiler_params=pltpu.CompilerParams(
            dimension_semantics=("parallel",),
            vmem_limit_bytes=vmem_limit,
        ),
        cost_estimate=cost,
    )(x, *ws, *bs, wh, bh)

    # Cheap slices outside the kernel (GenericBasis convention).
    backcast = out[:, :backcast_size]
    forecast = out[:, backcast_size : backcast_size + forecast_size]
    return backcast, forecast


# ----------------------------------------------------------------------------
# Init + reference
# ----------------------------------------------------------------------------
def init_params(key, input_size, theta_size, layer_num, layer_size):
    """Deterministic init matching torch.nn.Linear default (U[-1/sqrt(fan_in), +])."""

    def linear(key, fan_in, fan_out):
        kw, kb = jax.random.split(key)
        bound = 1.0 / math.sqrt(fan_in)
        w = jax.random.uniform(kw, (fan_out, fan_in), jnp.float32, -bound, bound)
        b = jax.random.uniform(kb, (fan_out,), jnp.float32, -bound, bound)
        return w, b

    keys = jax.random.split(key, layer_num + 2)
    fc_w, fc_b = [], []
    fan_in = input_size
    for i in range(layer_num):
        w, b = linear(keys[i], fan_in, layer_size)
        fc_w.append(w)
        fc_b.append(b)
        fan_in = layer_size
    wb, bb = linear(keys[layer_num], layer_size, theta_size)
    wf, bf = linear(keys[layer_num + 1], layer_size, theta_size)
    return fc_w, fc_b, wb, bb, wf, bf


def reference_forward(x, params, backcast_size, forecast_size):
    fc_w, fc_b, wb, bb, wf, bf = params
    h = x
    for w, b in zip(fc_w, fc_b):
        h = jnp.maximum(h @ w.T + b, 0.0)
    theta_b = h @ wb.T + bb
    theta_f = h @ wf.T + bf
    return theta_b[:, :backcast_size], theta_f[:, -forecast_size:]


# ----------------------------------------------------------------------------
# Demo / correctness checks
# ----------------------------------------------------------------------------
if __name__ == "__main__":
    # Small, module-consistent shapes.
    batch = 8
    input_size = 16        # backcast length
    forecast_size = 8
    theta_size = input_size + forecast_size  # generic basis convention
    layer_num = 3
    layer_size = 32

    key = jax.random.PRNGKey(0)
    kx, kp = jax.random.split(key)
    x = jax.random.normal(kx, (batch, input_size), jnp.float32)
    params = init_params(kp, input_size, theta_size, layer_num, layer_size)

    # ---- f32 path (tight tolerance) ----
    prepared_f32 = prepare_params(params, input_size, forecast_size, jnp.float32)
    fwd_f32 = jax.jit(
        functools.partial(
            nbeats_block_forward,
            backcast_size=input_size,
            forecast_size=forecast_size,
            compute_dtype=jnp.float32,
        )
    )
    backcast, forecast = fwd_f32(x, prepared_f32)
    jax.block_until_ready((backcast, forecast))

    ref_b, ref_f = reference_forward(x, params, input_size, forecast_size)
    assert backcast.shape == (batch, input_size)
    assert forecast.shape == (batch, forecast_size)
    assert jnp.allclose(backcast, ref_b, atol=1e-5, rtol=1e-5)
    assert jnp.allclose(forecast, ref_f, atol=1e-5, rtol=1e-5)

    # ---- multi-tile grid + ragged last block (no wrapper-side batch pad/slice) ----
    batch2 = 200
    x2 = jax.random.normal(jax.random.PRNGKey(1), (batch2, input_size), jnp.float32)
    fwd_tiled = jax.jit(
        functools.partial(
            nbeats_block_forward,
            backcast_size=input_size,
            forecast_size=forecast_size,
            block_m=64,                 # forces a 4-step grid with a ragged tail
            compute_dtype=jnp.float32,
        )
    )
    b2, f2 = fwd_tiled(x2, prepared_f32)
    jax.block_until_ready((b2, f2))
    rb2, rf2 = reference_forward(x2, params, input_size, forecast_size)
    assert b2.shape == (batch2, input_size) and f2.shape == (batch2, forecast_size)
    assert jnp.allclose(b2, rb2, atol=1e-4, rtol=1e-4)
    assert jnp.allclose(f2, rf2, atol=1e-4, rtol=1e-4)

    # ---- bf16 fast path (loose tolerance) ----
    prepared_bf16 = prepare_params(params, input_size, forecast_size, jnp.bfloat16)
    fwd_bf16 = jax.jit(
        functools.partial(
            nbeats_block_forward,
            backcast_size=input_size,
            forecast_size=forecast_size,
            compute_dtype=jnp.bfloat16,
        )
    )
    bb16, fb16 = fwd_bf16(x, prepared_bf16)
    jax.block_until_ready((bb16, fb16))
    assert jnp.allclose(bb16, ref_b, atol=1e-1, rtol=1e-1)
    assert jnp.allclose(fb16, ref_f, atol=1e-1, rtol=1e-1)

    print("KERNEL_OK")
</pallas_src>

<mosaic_0001>
module attributes {stable_mosaic.version = 11 : i64} {
  func.func @kernel(%arg0: i32, %arg1: memref<8x16xf32, #tpu.memory_space<vmem>>, %arg2: memref<16x128xf32, #tpu.memory_space<vmem>>, %arg3: memref<128x128xf32, #tpu.memory_space<vmem>>, %arg4: memref<128x128xf32, #tpu.memory_space<vmem>>, %arg5: memref<1x128xf32, #tpu.memory_space<vmem>>, %arg6: memref<1x128xf32, #tpu.memory_space<vmem>>, %arg7: memref<1x128xf32, #tpu.memory_space<vmem>>, %arg8: memref<128x128xf32, #tpu.memory_space<vmem>>, %arg9: memref<1x128xf32, #tpu.memory_space<vmem>>, %arg10: memref<8x128xf32, #tpu.memory_space<vmem>>) attributes {dimension_semantics = [#tpu.dimension_semantics<parallel>], iteration_bounds = array<i64: 1>, scalar_prefetch = 0 : i64, scratch_operands = 0 : i64, tpu.core_type = #tpu.core_type<tc>, window_params = [{transform_indices = @transform_0, window_bounds = array<i64: 8, 16>}, {pipeline_mode = #tpu.pipeline_mode<synchronous>, transform_indices = @transform_1, window_bounds = array<i64: 16, 128>}, {pipeline_mode = #tpu.pipeline_mode<synchronous>, transform_indices = @transform_2, window_bounds = array<i64: 128, 128>}, {pipeline_mode = #tpu.pipeline_mode<synchronous>, transform_indices = @transform_3, window_bounds = array<i64: 128, 128>}, {pipeline_mode = #tpu.pipeline_mode<synchronous>, transform_indices = @transform_4, window_bounds = array<i64: 1, 128>}, {pipeline_mode = #tpu.pipeline_mode<synchronous>, transform_indices = @transform_5, window_bounds = array<i64: 1, 128>}, {pipeline_mode = #tpu.pipeline_mode<synchronous>, transform_indices = @transform_6, window_bounds = array<i64: 1, 128>}, {pipeline_mode = #tpu.pipeline_mode<synchronous>, transform_indices = @transform_7, window_bounds = array<i64: 128, 128>}, {pipeline_mode = #tpu.pipeline_mode<synchronous>, transform_indices = @transform_8, window_bounds = array<i64: 1, 128>}, {transform_indices = @transform_9, window_bounds = array<i64: 8, 128>}]} {
    %c0 = arith.constant 0 : index
    %c0_0 = arith.constant 0 : index
    %0 = vector.load %arg1[%c0, %c0_0] : memref<8x16xf32, #tpu.memory_space<vmem>>, vector<8x16xf32>
    %c0_1 = arith.constant 0 : index
    %c0_2 = arith.constant 0 : index
    %1 = vector.load %arg2[%c0_1, %c0_2] : memref<16x128xf32, #tpu.memory_space<vmem>>, vector<16x128xf32>
    %cst = arith.constant dense<0.000000e+00> : vector<8x128xf32>
    %2 = tpu.matmul %0, %1, %cst {dimension_numbers = #tpu.dot_dimension_numbers<[1], [0], [0], [1], [0, 0, 1, 1], [], []>} : vector<8x16xf32>, vector<16x128xf32>, vector<8x128xf32> -> vector<8x128xf32>
    %c0_3 = arith.constant 0 : index
    %c0_4 = arith.constant 0 : index
    %3 = vector.load %arg5[%c0_3, %c0_4] : memref<1x128xf32, #tpu.memory_space<vmem>>, vector<1x128xf32>
    %4 = vector.broadcast %3 : vector<1x128xf32> to vector<8x128xf32>
    %5 = arith.addf %2, %4 : vector<8x128xf32>
    %cst_5 = arith.constant 0.000000e+00 : f32
    %6 = vector.broadcast %cst_5 : f32 to vector<8x128xf32>
    %7 = arith.maximumf %5, %6 : vector<8x128xf32>
    %c0_6 = arith.constant 0 : index
    %c0_7 = arith.constant 0 : index
    %8 = vector.load %arg3[%c0_6, %c0_7] : memref<128x128xf32, #tpu.memory_space<vmem>>, vector<128x128xf32>
    %cst_8 = arith.constant dense<0.000000e+00> : vector<8x128xf32>
    %9 = tpu.matmul %7, %8, %cst_8 {dimension_numbers = #tpu.dot_dimension_numbers<[1], [0], [0], [1], [0, 0, 1, 1], [], []>} : vector<8x128xf32>, vector<128x128xf32>, vector<8x128xf32> -> vector<8x128xf32>
    %c0_9 = arith.constant 0 : index
    %c0_10 = arith.constant 0 : index
    %10 = vector.load %arg6[%c0_9, %c0_10] : memref<1x128xf32, #tpu.memory_space<vmem>>, vector<1x128xf32>
    %11 = vector.broadcast %10 : vector<1x128xf32> to vector<8x128xf32>
    %12 = arith.addf %9, %11 : vector<8x128xf32>
    %cst_11 = arith.constant 0.000000e+00 : f32
    %13 = vector.broadcast %cst_11 : f32 to vector<8x128xf32>
    %14 = arith.maximumf %12, %13 : vector<8x128xf32>
    %c0_12 = arith.constant 0 : index
    %c0_13 = arith.constant 0 : index
    %15 = vector.load %arg4[%c0_12, %c0_13] : memref<128x128xf32, #tpu.memory_space<vmem>>, vector<128x128xf32>
    %cst_14 = arith.constant dense<0.000000e+00> : vector<8x128xf32>
    %16 = tpu.matmul %14, %15, %cst_14 {dimension_numbers = #tpu.dot_dimension_numbers<[1], [0], [0], [1], [0, 0, 1, 1], [], []>} : vector<8x128xf32>, vector<128x128xf32>, vector<8x128xf32> -> vector<8x128xf32>
    %c0_15 = arith.constant 0 : index
    %c0_16 = arith.constant 0 : index
    %17 = vector.load %arg7[%c0_15, %c0_16] : memref<1x128xf32, #tpu.memory_space<vmem>>, vector<1x128xf32>
    %18 = vector.broadcast %17 : vector<1x128xf32> to vector<8x128xf32>
    %19 = arith.addf %16, %18 : vector<8x128xf32>
    %cst_17 = arith.constant 0.000000e+00 : f32
    %20 = vector.broadcast %cst_17 : f32 to vector<8x128xf32>
    %21 = arith.maximumf %19, %20 : vector<8x128xf32>
    %c0_18 = arith.constant 0 : index
    %c0_19 = arith.constant 0 : index
    %22 = vector.load %arg8[%c0_18, %c0_19] : memref<128x128xf32, #tpu.memory_space<vmem>>, vector<128x128xf32>
    %cst_20 = arith.constant dense<0.000000e+00> : vector<8x128xf32>
    %23 = tpu.matmul %21, %22, %cst_20 {dimension_numbers = #tpu.dot_dimension_numbers<[1], [0], [0], [1], [0, 0, 1, 1], [], []>} : vector<8x128xf32>, vector<128x128xf32>, vector<8x128xf32> -> vector<8x128xf32>
    %c0_21 = arith.constant 0 : index
    %c0_22 = arith.constant 0 : index
    %24 = vector.load %arg9[%c0_21, %c0_22] : memref<1x128xf32, #tpu.memory_space<vmem>>, vector<1x128xf32>
    %25 = vector.broadcast %24 : vector<1x128xf32> to vector<8x128xf32>
    %26 = arith.addf %23, %25 : vector<8x128xf32>
    %c0_23 = arith.constant 0 : index
    %c0_24 = arith.constant 0 : index
    %27 = vector.load %arg10[%c0_23, %c0_24] : memref<8x128xf32, #tpu.memory_space<vmem>>, vector<8x128xf32>
    tpu.vector_store %arg10[%c0_23, %c0_24], %26 {strides = array<i32>} : memref<8x128xf32, #tpu.memory_space<vmem>>, vector<8x128xf32>,
    return
  }
  func.func @transform_0(%arg0: i32) -> (i32, i32) {
    %c0_i32 = arith.constant 0 : i32
    %c0_i32_0 = arith.constant 0 : i32
    return %arg0, %c0_i32 : i32, i32
  }
  func.func @transform_1(%arg0: i32) -> (i32, i32) {
    %c0_i32 = arith.constant 0 : i32
    %c0_i32_0 = arith.constant 0 : i32
    %c0_i32_1 = arith.constant 0 : i32
    return %c0_i32, %c0_i32_0 : i32, i32
  }
  func.func @transform_2(%arg0: i32) -> (i32, i32) {
    %c0_i32 = arith.constant 0 : i32
    %c0_i32_0 = arith.constant 0 : i32
    %c0_i32_1 = arith.constant 0 : i32
    return %c0_i32, %c0_i32_0 : i32, i32
  }
  func.func @transform_3(%arg0: i32) -> (i32, i32) {
    %c0_i32 = arith.constant 0 : i32
    %c0_i32_0 = arith.constant 0 : i32
    %c0_i32_1 = arith.constant 0 : i32
    return %c0_i32, %c0_i32_0 : i32, i32
  }
  func.func @transform_4(%arg0: i32) -> (i32, i32) {
    %c0_i32 = arith.constant 0 : i32
    %c0_i32_0 = arith.constant 0 : i32
    %c0_i32_1 = arith.constant 0 : i32
    return %c0_i32, %c0_i32_0 : i32, i32
  }
  func.func @transform_5(%arg0: i32) -> (i32, i32) {
    %c0_i32 = arith.constant 0 : i32
    %c0_i32_0 = arith.constant 0 : i32
    %c0_i32_1 = arith.constant 0 : i32
    return %c0_i32, %c0_i32_0 : i32, i32
  }
  func.func @transform_6(%arg0: i32) -> (i32, i32) {
    %c0_i32 = arith.constant 0 : i32
    %c0_i32_0 = arith.constant 0 : i32
    %c0_i32_1 = arith.constant 0 : i32
    return %c0_i32, %c0_i32_0 : i32, i32
  }
  func.func @transform_7(%arg0: i32) -> (i32, i32) {
    %c0_i32 = arith.constant 0 : i32
    %c0_i32_0 = arith.constant 0 : i32
    %c0_i32_1 = arith.constant 0 : i32
    return %c0_i32, %c0_i32_0 : i32, i32
  }
  func.func @transform_8(%arg0: i32) -> (i32, i32) {
    %c0_i32 = arith.constant 0 : i32
    %c0_i32_0 = arith.constant 0 : i32
    %c0_i32_1 = arith.constant 0 : i32
    return %c0_i32, %c0_i32_0 : i32, i32
  }
  func.func @transform_9(%arg0: i32) -> (i32, i32) {
    %c0_i32 = arith.constant 0 : i32
    %c0_i32_0 = arith.constant 0 : i32
    return %arg0, %c0_i32 : i32, i32
  }
}

</mosaic_0001>

<bundles_post_ra>
// kernel: nbeats_block_forward.1
= control target key start
LH: loop header
LB: loop body
LE: loop exit
PB: predicated region body
PF: predicated region fallthrough
CT: control target
= control target key end

     0   :  { %14 = vsyncpa [#allocation3], 0  ;;  %s917_s0 = inlined_call_operand.hbm [shape: f32[8,16], index: 0, kind: input, shape index: {}]   ;;  %s918_s1 = inlined_call_operand.hbm [shape: f32[16,128], index: 1, kind: input, shape index: {}]   ;;  %s919_s2 = inlined_call_operand.hbm [shape: f32[128,128], index: 2, kind: input, shape index: {}]   ;;  %s920_s3 = inlined_call_operand.hbm [shape: f32[128,128], index: 3, kind: input, shape index: {}]   ;;  %s921_s4 = inlined_call_operand.vmem [shape: f32[1,128], index: 4, kind: input, shape index: {}]   ;;  %s922_s5 = inlined_call_operand.vmem [shape: f32[1,128], index: 5, kind: input, shape index: {}]   ;;  %s923_s6 = inlined_call_operand.vmem [shape: f32[1,128], index: 6, kind: input, shape index: {}]   ;;  %s924_s7 = inlined_call_operand.hbm [shape: f32[128,128], index: 7, kind: input, shape index: {}]   ;;  %s925_s8 = inlined_call_operand.vmem [shape: f32[1,128], index: 8, kind: input, shape index: {}]   ;;  %s926_s9 = inlined_call_operand.vmem [shape: f32[8,128], index: 9, kind: output, shape index: {}]  }
   0x1   :  { %15 = vsyncpa [#allocation5], 0 }
   0x2   :  { %16 = vsyncpa [#allocation8], 0  ;;  %s758_s30 = smov [#allocation4]  }
   0x3   :  { %s32_s10 = sshll.u32 %s758_s30, 4  ;;  %s33_s10 = int_to_ptr.vmem [resolvable:$true] %s32_s10 }
   0x4   :  { %s660_s11 = scalar_lea.vmem %s33_s10, 256  ;;  %p665_p1 = scmp.lt.s32.totalorder %s33_s10, %s33_s10 }
   0x5   :  { %p661_p0 = scmp.ne.s32.totalorder %s33_s10, %s660_s11  ;;  %p666_p2 = scmp.lt.s32.totalorder %s660_s11, %s660_s11 }
   0x7   :  { %p667_p3 = por %p666_p2, %p665_p1 }
   0x9   :  { %p668_p4 = pnand %p667_p3, %p661_p0 }
   0xb   :  { %671 = shalt.err (!%p668_p4)
}
   0xc   :  { %s759_s12 = smov 128   ;;  %s760_s13 = smov 8  }
   0xd   :  { %38 = dma.hbm_to_vmem [thread:$0]  %s918_s1, 256, %s33_s10, [#allocation5], %s759_s12, %s759_s12, %s760_s13  }
   0xe   :  { %s761_s16 = smov [#allocation7]   ;;  %s762_s18 = smov [#allocation2]  }
   0xf   :  { %s56_s17 = sshll.u32 %s761_s16, 4  ;;  %s23_s19 = sshll.u32 %s762_s18, 4  ;;  %s57_s17 = int_to_ptr.vmem [resolvable:$true] %s56_s17  ;;  %s24_s19 = int_to_ptr.vmem [resolvable:$true] %s23_s19 }
  0x10   :  { %s680_s20 = scalar_lea.vmem %s57_s17, 2048  ;;  %p685_p6 = scmp.lt.s32.totalorder %s57_s17, %s57_s17 }
  0x11   :  { %p681_p5 = scmp.ne.s32.totalorder %s57_s17, %s680_s20  ;;  %p686_p7 = scmp.lt.s32.totalorder %s680_s20, %s680_s20 }
  0x13   :  { %p687_p8 = por %p686_p7, %p685_p6 }
  0x15   :  { %p688_p9 = pnand %p687_p8, %p681_p5 }
  0x17   :  { %691 = shalt.err (!%p688_p9)
}
  0x18   :  { %62 = dma.hbm_to_vmem [thread:$0]  %s920_s3, 2048, %s57_s17, [#allocation8], %s759_s12, %s759_s12, %s760_s13  }
  0x19   :  { %s700_s1 = scalar_lea.vmem %s24_s19, 128  ;;  %p705_p11 = scmp.lt.s32.totalorder %s24_s19, %s24_s19 }
  0x1a   :  { %p701_p10 = scmp.ne.s32.totalorder %s24_s19, %s700_s1  ;;  %p706_p12 = scmp.lt.s32.totalorder %s700_s1, %s700_s1 }
  0x1c   :  { %p707_p13 = por %p706_p12, %p705_p11 }
  0x1e   :  { %p708_p0 = pnand %p707_p13, %p701_p10 }
  0x20   :  { %711 = shalt.err (!%p708_p0)
}
  0x21   :  { %26 = dma.hbm_to_vmem [thread:$0]  %s917_s0, 128, %s24_s19, [#allocation3]  }
  0x22   :  { %s763_s25 = smov [#allocation6]   ;;  %s764_s27 = smov [#allocation9]  }
  0x23   :  { %s44_s26 = sshll.u32 %s763_s25, 4  ;;  %s74_s28 = sshll.u32 %s764_s27, 4  ;;  %s45_s26 = int_to_ptr.vmem [resolvable:$true] %s44_s26  ;;  %s75_s28 = int_to_ptr.vmem [resolvable:$true] %s74_s28 }
  0x24   :  { %s720_s29 = scalar_lea.vmem %s45_s26, 2048  ;;  %p725_p2 = scmp.lt.s32.totalorder %s45_s26, %s45_s26 }
  0x25   :  { %p721_p1 = scmp.ne.s32.totalorder %s45_s26, %s720_s29  ;;  %p726_p3 = scmp.lt.s32.totalorder %s720_s29, %s720_s29 }
  0x27   :  { %p727_p4 = por %p726_p3, %p725_p2 }
  0x29   :  { %p728_p5 = pnand %p727_p4, %p721_p1 }
  0x2b   :  { %731 = shalt.err (!%p728_p5)
}
  0x2c   :  { %50 = dma.hbm_to_vmem [thread:$0]  %s919_s2, 2048, %s45_s26, [#allocation5], %s759_s12, %s759_s12, %s760_s13  }
  0x2d   :  { %s740_s0 = scalar_lea.vmem %s75_s28, 2048  ;;  %p745_p7 = scmp.lt.s32.totalorder %s75_s28, %s75_s28 }
  0x2e   :  { %p741_p6 = scmp.ne.s32.totalorder %s75_s28, %s740_s0  ;;  %p746_p8 = scmp.lt.s32.totalorder %s740_s0, %s740_s0 }
  0x30   :  { %p747_p9 = por %p746_p8, %p745_p7 }
  0x32   :  { %p748_p10 = pnand %p747_p9, %p741_p6 }
  0x34   :  { %751 = shalt.err (!%p748_p10)
}
  0x35   :  { %80 = dma.hbm_to_vmem [thread:$0]  %s924_s7, 2048, %s75_s28, [#allocation8], %s759_s12, %s759_s12, %s760_s13  }
  0x36   :  { %752 = dma.done.wait [#allocation3], 128  }
  0x37   :  { %753 = vsyncadd [#allocation3], 4294967168 }
  0x38   :  { %754 = dma.done.wait [#allocation5], 2304  }
  0x39   :  { %755 = vsyncadd [#allocation5], 4294964992 }
  0x3a   :  { %756 = dma.done.wait [#allocation8], 4096  }
  0x3b   :  { %757 = vsyncadd [#allocation8], 4294963200  ;;  %v765_v0 = vmov 0.0   ;;  %vm766_vm0 = vmmov 0   ;;  %v100_v1 = vld [vmem:[#allocation4 + $0x8] sm:$0xff]  ;;  %v99_v2 = vld [vmem:[#allocation4] sm:$0xff] }
  0x3c   :  { %531 = vmatprep.subr.mxu0 %v765_v0  ;;  %535 = vmatprep.mubr.msk.f32.mxu0 %vm766_vm0, %v765_v0  ;;  %v98_v3 = vld [vmem:[#allocation2] sm:$0xff]  ;;  %vm108_vm1 = vcmask 130048   ;;  %v198_v4 = vld [vmem:[#allocation6 + $0x78] sm:$0xff]  ;;  %v197_v5 = vld [vmem:[#allocation6 + $0x70] sm:$0xff] }
  0x3d   :  { %538 = vmatprep.subr.mxu1 %v765_v0  ;;  %570 = vmatprep.mubr.msk.f32.mxu1 %vm766_vm0, %v765_v0  ;;  %v196_v6 = vld [vmem:[#allocation6 + $0x68] sm:$0xff]  ;;  %v195_v7 = vld [vmem:[#allocation6 + $0x60] sm:$0xff]  ;;  %v194_v8 = vld [vmem:[#allocation6 + $0x58] sm:$0xff] }
  0x3e   :  { %532 = vmatpush3.msra.mxu0 %v100_v1  ;;  %539 = vmatpush3.msra.mxu1 %v198_v4  ;;  %v193_v9 = vld [vmem:[#allocation6 + $0x50] sm:$0xff]  ;;  %v192_v10 = vld [vmem:[#allocation6 + $0x48] sm:$0xff]  ;;  %v191_v11 = vld [vmem:[#allocation6 + $0x40] sm:$0xff] }
  0x3f   :  { %533 = vmatprep.subr.mxu0 %v765_v0  ;;  %540 = vmatprep.subr.mxu1 %v765_v0  ;;  %v190_v12 = vld [vmem:[#allocation6 + $0x38] sm:$0xff]  ;;  %v189_v13 = vld [vmem:[#allocation6 + $0x30] sm:$0xff]  ;;  %v188_v14 = vld [vmem:[#allocation6 + $0x28] sm:$0xff] }
  0x40   :  { %534 = vmatpush3.msra.mxu0 %v99_v2  ;;  %541 = vmatpush3.msra.mxu1 %v197_v5  ;;  %v187_v15 = vld [vmem:[#allocation6 + $0x20] sm:$0xff]  ;;  %v186_v16 = vld [vmem:[#allocation6 + $0x18] sm:$0xff]  ;;  %v185_v17 = vld [vmem:[#allocation6 + $0x10] sm:$0xff] }
  0x41   :  { %536 = vmatmul.mubr.msk.f32.vlgmr.msra.gmra.mxu0 %vm108_vm1, %v98_v3  ;;  %542 = vmatprep.subr.mxu1 %v765_v0  ;;  %v184_v18 = vld [vmem:[#allocation6 + $0x8] sm:$0xff]  ;;  %v183_v19 = vld [vmem:[#allocation6] sm:$0xff]  ;;  %v292_v20 = vld [vmem:[#allocation7 + $0x78] sm:$0xff] }
  0x42   :  { %573 = vmatprep.subr.mxu0 %v765_v0  ;;  %543 = vmatpush3.msra.mxu1 %v196_v6  ;;  %v291_v21 = vld [vmem:[#allocation7 + $0x70] sm:$0xff]  ;;  %v290_v22 = vld [vmem:[#allocation7 + $0x68] sm:$0xff]  ;;  %v289_v23 = vld [vmem:[#allocation7 + $0x60] sm:$0xff] }
  0x43   :  { %605 = vmatprep.mubr.msk.f32.mxu0 %vm766_vm0, %v765_v0  ;;  %544 = vmatprep.subr.mxu1 %v765_v0  ;;  %v288_v24 = vld [vmem:[#allocation7 + $0x58] sm:$0xff]  ;;  %v287_v25 = vld [vmem:[#allocation7 + $0x50] sm:$0xff]  ;;  %v286_v26 = vld [vmem:[#allocation7 + $0x48] sm:$0xff] }
  0x44   :  { %545 = vmatpush3.msra.mxu1 %v195_v7  ;;  %574 = vmatpush3.msra.mxu0 %v292_v20  ;;  %v285_v27 = vld [vmem:[#allocation7 + $0x40] sm:$0xff]  ;;  %v284_v28 = vld [vmem:[#allocation7 + $0x38] sm:$0xff]  ;;  %v283_v29 = vld [vmem:[#allocation7 + $0x30] sm:$0xff] }
  0x45   :  { %546 = vmatprep.subr.mxu1 %v765_v0  ;;  %575 = vmatprep.subr.mxu0 %v765_v0  ;;  %v282_v30 = vld [vmem:[#allocation7 + $0x28] sm:$0xff]  ;;  %v281_v31 = vld [vmem:[#allocation7 + $0x20] sm:$0xff]  ;;  %v280_v32 = vld [vmem:[#allocation7 + $0x18] sm:$0xff] }
  0x46   :  { %547 = vmatpush3.msra.mxu1 %v194_v8  ;;  %576 = vmatpush3.msra.mxu0 %v291_v21  ;;  %v472_v33 = vld [vmem:[%s921_s4] ss:$0 sm:$0xff]  ;;  %v279_v38 = vld [vmem:[#allocation7 + $0x10] sm:$0xff]  ;;  %v277_v40 = vld [vmem:[#allocation7] sm:$0xff] }
  0x47   :  { %548 = vmatprep.subr.mxu1 %v765_v0  ;;  %577 = vmatprep.subr.mxu0 %v765_v0  ;;  %v278_v39 = vld [vmem:[#allocation7 + $0x8] sm:$0xff]  ;;  %v386_v41 = vld [vmem:[#allocation9 + $0x78] sm:$0xff]  ;;  %v385_v42 = vld [vmem:[#allocation9 + $0x70] sm:$0xff] }
  0x48   :  { %549 = vmatpush3.msra.mxu1 %v193_v9  ;;  %578 = vmatpush3.msra.mxu0 %v290_v22  ;;  %v384_v43 = vld [vmem:[#allocation9 + $0x68] sm:$0xff]  ;;  %v383_v44 = vld [vmem:[#allocation9 + $0x60] sm:$0xff]  ;;  %v382_v45 = vld [vmem:[#allocation9 + $0x58] sm:$0xff] }
  0x49   :  { %550 = vmatprep.subr.mxu1 %v765_v0  ;;  %579 = vmatprep.subr.mxu0 %v765_v0  ;;  %v381_v46 = vld [vmem:[#allocation9 + $0x50] sm:$0xff]  ;;  %v380_v47 = vld [vmem:[#allocation9 + $0x48] sm:$0xff]  ;;  %v379_v48 = vld [vmem:[#allocation9 + $0x40] sm:$0xff] }
  0x4a   :  { %551 = vmatpush3.msra.mxu1 %v192_v10  ;;  %580 = vmatpush3.msra.mxu0 %v289_v23  ;;  %v378_v49 = vld [vmem:[#allocation9 + $0x38] sm:$0xff]  ;;  %v377_v50 = vld [vmem:[#allocation9 + $0x30] sm:$0xff]  ;;  %v376_v51 = vld [vmem:[#allocation9 + $0x28] sm:$0xff] }
  0x4b   :  { %552 = vmatprep.subr.mxu1 %v765_v0  ;;  %581 = vmatprep.subr.mxu0 %v765_v0  ;;  %v375_v52 = vld [vmem:[#allocation9 + $0x20] sm:$0xff]  ;;  %v374_v53 = vld [vmem:[#allocation9 + $0x18] sm:$0xff]  ;;  %v474_v54 = vld [vmem:[%s922_s5] ss:$0 sm:$0xff] }
  0x4c   :  { %553 = vmatpush3.msra.mxu1 %v191_v11  ;;  %582 = vmatpush3.msra.mxu0 %v288_v24  ;;  %v373_v59 = vld [vmem:[#allocation9 + $0x10] sm:$0xff]  ;;  %v372_v60 = vld [vmem:[#allocation9 + $0x8] sm:$0xff]  ;;  %v371_v61 = vld [vmem:[#allocation9] sm:$0xff] }
  0x4d   :  { %554 = vmatprep.subr.mxu1 %v765_v0  ;;  %583 = vmatprep.subr.mxu0 %v765_v0  ;;  %v475_v62 = vld [vmem:[%s923_s6] ss:$0 sm:$0xff] }
  0x4e   :  { %555 = vmatpush3.msra.mxu1 %v190_v12  ;;  %584 = vmatpush3.msra.mxu0 %v287_v25  ;;  %v476_v4 = vld [vmem:[%s925_s8] ss:$0 sm:$0xff] }
  0x4f   :  { %556 = vmatprep.subr.mxu1 %v765_v0  ;;  %585 = vmatprep.subr.mxu0 %v765_v0 }
  0x50   :  { %557 = vmatpush3.msra.mxu1 %v189_v13  ;;  %586 = vmatpush3.msra.mxu0 %v286_v26 }
  0x51   :  { %558 = vmatprep.subr.mxu1 %v765_v0  ;;  %587 = vmatprep.subr.mxu0 %v765_v0 }
  0x52   :  { %559 = vmatpush3.msra.mxu1 %v188_v14  ;;  %588 = vmatpush3.msra.mxu0 %v285_v27 }
  0x53   :  { %560 = vmatprep.subr.mxu1 %v765_v0  ;;  %589 = vmatprep.subr.mxu0 %v765_v0 }
  0x54   :  { %561 = vmatpush3.msra.mxu1 %v187_v15  ;;  %590 = vmatpush3.msra.mxu0 %v284_v28 }
  0x55   :  { %562 = vmatprep.subr.mxu1 %v765_v0  ;;  %591 = vmatprep.subr.mxu0 %v765_v0 }
  0x56   :  { %563 = vmatpush3.msra.mxu1 %v186_v16  ;;  %592 = vmatpush3.msra.mxu0 %v283_v29 }
  0x57   :  { %564 = vmatprep.subr.mxu1 %v765_v0  ;;  %593 = vmatprep.subr.mxu0 %v765_v0 }
  0x58   :  { %565 = vmatpush3.msra.mxu1 %v185_v17  ;;  %594 = vmatpush3.msra.mxu0 %v282_v30 }
  0x59   :  { %566 = vmatprep.subr.mxu1 %v765_v0  ;;  %595 = vmatprep.subr.mxu0 %v765_v0 }
  0x5a   :  { %567 = vmatpush3.msra.mxu1 %v184_v18  ;;  %596 = vmatpush3.msra.mxu0 %v281_v31 }
  0x5b   :  { %568 = vmatprep.subr.mxu1 %v765_v0  ;;  %597 = vmatprep.subr.mxu0 %v765_v0 }
  0x5c   :  { %569 = vmatpush3.msra.mxu1 %v183_v19  ;;  %598 = vmatpush3.msra.mxu0 %v280_v32 }
  0x5d   :  { %608 = vmatprep.subr.mxu1 %v765_v0  ;;  %599 = vmatprep.subr.mxu0 %v765_v0 }
  0x5e   :  { %600 = vmatpush3.msra.mxu0 %v279_v38 }
  0x5f   :  { %601 = vmatprep.subr.mxu0 %v765_v0 }
  0x60   :  { %602 = vmatpush3.msra.mxu0 %v278_v39 }
  0x61   :  { %603 = vmatprep.subr.mxu0 %v765_v0 }
  0x62   :  { %604 = vmatpush3.msra.mxu0 %v277_v40 }
 0x101   :  { %v178_v34 = vpop.f32.mrf.mxu0 }
 0x102   :  { %v179_v35 = vadd.f32 %v472_v33, %v178_v34 }
 0x103   :  { %v537_v36 = vpop.f32.mrf.mxu0 }
 0x104   :  { %v182_v37 = vmax.f32 %v179_v35, 0.0 }
 0x106   :  { %571 = vmatmul.mubr.f32.vlgmr.msra.gmra.mxu1 %v182_v37 }
 0x107   :  { %640 = vmatprep.mubr.msk.f32.mxu1 %vm766_vm0, %v765_v0  ;;  %609 = vmatpush3.msra.mxu1 %v386_v41 }
 0x108   :  { %610 = vmatprep.subr.mxu1 %v765_v0 }
 0x109   :  { %611 = vmatpush3.msra.mxu1 %v385_v42 }
 0x10a   :  { %612 = vmatprep.subr.mxu1 %v765_v0 }
 0x10b   :  { %613 = vmatpush3.msra.mxu1 %v384_v43 }
 0x10c   :  { %614 = vmatprep.subr.mxu1 %v765_v0 }
 0x10d   :  { %615 = vmatpush3.msra.mxu1 %v383_v44 }
 0x10e   :  { %616 = vmatprep.subr.mxu1 %v765_v0 }
 0x10f   :  { %617 = vmatpush3.msra.mxu1 %v382_v45 }
 0x110   :  { %618 = vmatprep.subr.mxu1 %v765_v0 }
 0x111   :  { %619 = vmatpush3.msra.mxu1 %v381_v46 }
 0x112   :  { %620 = vmatprep.subr.mxu1 %v765_v0 }
 0x113   :  { %621 = vmatpush3.msra.mxu1 %v380_v47 }
 0x114   :  { %622 = vmatprep.subr.mxu1 %v765_v0 }
 0x115   :  { %623 = vmatpush3.msra.mxu1 %v379_v48 }
 0x116   :  { %624 = vmatprep.subr.mxu1 %v765_v0 }
 0x117   :  { %625 = vmatpush3.msra.mxu1 %v378_v49 }
 0x118   :  { %626 = vmatprep.subr.mxu1 %v765_v0 }
 0x119   :  { %627 = vmatpush3.msra.mxu1 %v377_v50 }
 0x11a   :  { %628 = vmatprep.subr.mxu1 %v765_v0 }
 0x11b   :  { %629 = vmatpush3.msra.mxu1 %v376_v51 }
 0x11c   :  { %630 = vmatprep.subr.mxu1 %v765_v0 }
 0x11d   :  { %631 = vmatpush3.msra.mxu1 %v375_v52 }
 0x11e   :  { %632 = vmatprep.subr.mxu1 %v765_v0 }
 0x11f   :  { %633 = vmatpush3.msra.mxu1 %v374_v53 }
 0x120   :  { %634 = vmatprep.subr.mxu1 %v765_v0 }
 0x121   :  { %635 = vmatpush3.msra.mxu1 %v373_v59 }
 0x122   :  { %636 = vmatprep.subr.mxu1 %v765_v0 }
 0x123   :  { %637 = vmatpush3.msra.mxu1 %v372_v60 }
 0x124   :  { %638 = vmatprep.subr.mxu1 %v765_v0 }
 0x125   :  { %639 = vmatpush3.msra.mxu1 %v371_v61 }
 0x1c6   :  { %v272_v55 = vpop.f32.mrf.mxu1 }
 0x1c7   :  { %v273_v56 = vadd.f32 %v474_v54, %v272_v55 }
 0x1c8   :  { %v572_v57 = vpop.f32.mrf.mxu1 }
 0x1c9   :  { %v276_v58 = vmax.f32 %v273_v56, 0.0 }
 0x1cb   :  { %606 = vmatmul.mubr.f32.vlgmr.msra.gmra.mxu0 %v276_v58 }
 0x28b   :  { %v366_v63 = vpop.f32.mrf.mxu0 }
 0x28c   :  { %v367_v1 = vadd.f32 %v475_v62, %v366_v63 }
 0x28d   :  { %v607_v2 = vpop.f32.mrf.mxu0 }
 0x28e   :  { %v370_v3 = vmax.f32 %v367_v1, 0.0 }
 0x290   :  { %641 = vmatmul.mubr.f32.vlgmr.msra.gmra.mxu1 %v370_v3 }
 0x350   :  { %v460_v5 = vpop.f32.mrf.mxu1 }
 0x351   :  { %v461_v6 = vadd.f32 %v476_v4, %v460_v5 }
 0x352   :  { %v642_v7 = vpop.f32.mrf.mxu1 }
 0x353   :  { %464 = vst [vmem:[%s926_s9] sm:$0xff] %v461_v6 }
 0x354   :  { %469 = vsyncpa [#allocation3], 1 }
 0x355   :  { %470 = vsyncpa [#allocation5], 1 }
 0x356   :  { %471 = vsyncpa [#allocation8], 1 }

</bundles_post_ra>
